<compile_context>
chip_gen: v5e
topology: v5e:2x2
jax: 0.10.0
libtpu: 0.0.40
codegen_flags: <defaults>
</compile_context>

<pallas_src>
import functools
import math

import jax
import jax.numpy as jnp
from jax.experimental import pallas as pl
from jax.experimental.pallas import tpu as pltpu


def _gelu(x, approximate):
    if approximate:
        # tanh-approx gelu -> EUP (separate VLIW slot, nearly free under the MXU)
        return jax.nn.gelu(x, approximate=True)
    # exact erf gelu (matches torch nn.GELU default); power=1.0 in Activation is a no-op
    return 0.5 * x * (1.0 + jax.lax.erf(x * (1.0 / math.sqrt(2.0))))


def gpt2_mlp_kernel(x_ref, w1_ref, b1_ref, w2_ref, b2_ref, w3_ref, b3_ref,
                    o_ref, *, approximate_gelu):
    # One grid step processes a (tm, E) row tile; weights/biases are VMEM-resident.
    # MXU operand dtype == weight dtype (bf16 by default); accumulation in f32.
    cdt = w1_ref.dtype
    x = x_ref[...].astype(cdt)                       # VPU cast, hidden under the MXU
    h = jnp.dot(x, w1_ref[...], preferred_element_type=jnp.float32)
    h = _gelu(h + b1_ref[...], approximate_gelu).astype(cdt)   # materialize only cdt copy
    h = jnp.dot(h, w2_ref[...], preferred_element_type=jnp.float32)
    h = _gelu(h + b2_ref[...], approximate_gelu).astype(cdt)
    y = jnp.dot(h, w3_ref[...], preferred_element_type=jnp.float32) + b3_ref[...]
    o_ref[...] = y.astype(o_ref.dtype)


def _round_up(x, m):
    return (x + m - 1) // m * m


@functools.lru_cache(maxsize=None)
def _vmem_capacity_bytes():
    try:
        return int(pltpu.get_tpu_info().vmem_capacity_bytes)
    except Exception:  # info query unavailable -> conservative (v7x per-TC size)
        return 64 << 20


def prepare_params(params, compute_dtype=jnp.bfloat16):
    """One-time parameter conversion OUTSIDE the hot path: MXU-operand weights in
    compute_dtype, biases in f32.  Call once at init / checkpoint load, not per step."""
    w1, b1, w2, b2, w3, b3 = params
    cvt = lambda w: jnp.asarray(w, compute_dtype)
    return (cvt(w1), jnp.asarray(b1, jnp.float32),
            cvt(w2), jnp.asarray(b2, jnp.float32),
            cvt(w3), jnp.asarray(b3, jnp.float32))


@functools.partial(
    jax.jit,
    static_argnames=("block_m", "approximate_gelu", "single_buffer_weights"))
def gpt2_mlp(x, w1, b1, w2, b2, w3, b3, *, block_m=512,
             approximate_gelu=True, single_buffer_weights=True):
    """x: [B, S, E] -> [B, S, E].  Output dtype == x.dtype; MXU dtype == weight dtype."""
    B, S, E = x.shape
    M = B * S
    H1 = w1.shape[1]          # 2E
    H2 = w2.shape[1]          # 2E
    Eo = w3.shape[1]          # E
    out_dtype = x.dtype

    w_itemsize = jnp.dtype(w1.dtype).itemsize
    x_itemsize = jnp.dtype(x.dtype).itemsize
    out_itemsize = jnp.dtype(out_dtype).itemsize

    wbuf = 1 if single_buffer_weights else 2
    weight_bytes = (E * H1 + H1 * H2 + H2 * Eo) * w_itemsize * wbuf
    bias_bytes = (H1 + H2 + Eo) * 4 * wbuf

    def _tile_bytes(tm):
        io = 2 * tm * E * x_itemsize + 2 * tm * Eo * out_itemsize   # double-buffered x/out
        interm = tm * max(H1, H2) * (4 + w_itemsize)                # f32 transient + cdt copy
        return io + interm

    vmem_cap = _vmem_capacity_bytes()
    budget = int(vmem_cap * 0.85)

    # Row tile: multiple of 8 (f32 sublane), default 512 (MXU-friendly on all gens);
    # shrink until resident weights + pipelined tiles fit this generation's VMEM.
    tm = max(_round_up(min(block_m, _round_up(M, 8)), 8), 8)
    while tm > 8 and weight_bytes + bias_bytes + _tile_bytes(tm) > budget:
        tm = max(_round_up(tm // 2, 8), 8)
    # Keep >= 2 grid steps so dimension_semantics=('parallel',) can shard rows
    # across v7x's two TensorCores (a 1-step grid idles half the chip).
    if M > 8 and _round_up(M, tm) // tm < 2:
        tm = max(_round_up(pl.cdiv(M, 2), 8), 8)
    M_pad = _round_up(M, tm)
    grid = (M_pad // tm,)

    # x stays in its native dtype: reshape + pad only, no extra HBM cast pass.
    x2d = x.reshape(M, E)
    if M_pad != M:
        x2d = jnp.pad(x2d, ((0, M_pad - M), (0, 0)))

    # biases are tiny; keep/cast to f32 (added onto the f32 accumulator).
    b1r = b1.astype(jnp.float32).reshape(1, H1)
    b2r = b2.astype(jnp.float32).reshape(1, H2)
    b3r = b3.astype(jnp.float32).reshape(1, Eo)

    resident = lambda i: (0, 0)   # weights/biases: same (whole) block every grid step
    if single_buffer_weights:
        wspec = lambda shape: pl.BlockSpec(shape, resident,
                                           pipeline_mode=pl.Buffered(1))
    else:
        wspec = lambda shape: pl.BlockSpec(shape, resident)

    need = weight_bytes + bias_bytes + _tile_bytes(tm)
    vmem_limit = min(int(need * 1.25) + (4 << 20), int(vmem_cap * 0.9))
    vmem_limit = max(vmem_limit, 16 << 20)

    flops = 2 * M_pad * (E * H1 + H1 * H2 + H2 * Eo)
    transcendentals = M_pad * (H1 + H2)
    bytes_accessed = (M_pad * E * x_itemsize
                      + (weight_bytes + bias_bytes) // wbuf
                      + M_pad * Eo * out_itemsize)
    cost = pl.CostEstimate(flops=flops, transcendentals=transcendentals,
                           bytes_accessed=bytes_accessed)

    out2d = pl.pallas_call(
        functools.partial(gpt2_mlp_kernel, approximate_gelu=approximate_gelu),
        out_shape=jax.ShapeDtypeStruct((M_pad, Eo), out_dtype),
        grid_spec=pltpu.PrefetchScalarGridSpec(
            num_scalar_prefetch=0,
            grid=grid,
            in_specs=[
                pl.BlockSpec((tm, E), lambda i: (i, 0)),   # x row tile (pipelined)
                wspec((E, H1)), wspec((1, H1)),
                wspec((H1, H2)), wspec((1, H2)),
                wspec((H2, Eo)), wspec((1, Eo)),
            ],
            out_specs=pl.BlockSpec((tm, Eo), lambda i: (i, 0)),
        ),
        compiler_params=pltpu.CompilerParams(
            dimension_semantics=("parallel",),
            vmem_limit_bytes=vmem_limit),
        cost_estimate=cost,
    )(x2d, w1, b1r, w2, b2r, w3, b3r)

    if M_pad != M:
        out2d = out2d[:M]
    return out2d.reshape(B, S, Eo)


def _run(x, params, **kwargs):
    """Call the fused kernel; if this JAX build rejects single-buffered
    (pl.Buffered(1)) weight specs, log it and fall back to double-buffered weights."""
    try:
        return gpt2_mlp(x, *params, **kwargs)
    except (pltpu.LoweringException, NotImplementedError, TypeError) as e:
        print(f"# pl.Buffered(1) weight specs unsupported ({type(e).__name__}); "
              "falling back to double-buffered weights")
        kwargs.pop("single_buffer_weights", None)
        return gpt2_mlp(x, *params, single_buffer_weights=False, **kwargs)


def init_params(key, embed_dim, mults=(2, 2)):
    """Deterministic init matching Conv1D: weight ~ N(0, 0.02), bias = 0."""
    k1, k2, k3 = jax.random.split(key, 3)
    E = embed_dim
    d1 = E * mults[0]
    d2 = E * mults[1]
    w1 = jax.random.normal(k1, (E, d1), jnp.float32) * 0.02
    b1 = jnp.zeros((d1,), jnp.float32)
    w2 = jax.random.normal(k2, (d1, d2), jnp.float32) * 0.02
    b2 = jnp.zeros((d2,), jnp.float32)
    w3 = jax.random.normal(k3, (d2, E), jnp.float32) * 0.02
    b3 = jnp.zeros((E,), jnp.float32)
    return w1, b1, w2, b2, w3, b3


def reference(x, w1, b1, w2, b2, w3, b3, approximate=True):
    h = _gelu(x @ w1 + b1, approximate)
    h = _gelu(h @ w2 + b2, approximate)
    return h @ w3 + b3


if __name__ == "__main__":
    key = jax.random.PRNGKey(0)
    kx, kp, kx2, kp2 = jax.random.split(key, 4)

    # --- small smoke test (batch=2, seq=8, hidden=32) ---
    B, S, E = 2, 8, 32
    x = jax.random.normal(kx, (B, S, E), jnp.float32)
    params = init_params(kp, E)

    # exact-erf f32 path (bit-faithful to torch nn.GELU default): f32 weights
    out_f32 = jax.block_until_ready(_run(x, params, approximate_gelu=False))
    ref_f32 = reference(x, *params, approximate=False)
    assert out_f32.shape == (B, S, E)
    assert jnp.allclose(out_f32, ref_f32, atol=1e-5, rtol=1e-5), "f32/erf path mismatch"

    # default performance path: bf16 weights converted ONCE + tanh GELU
    params_bf16 = prepare_params(params)
    out_bf16 = jax.block_until_ready(_run(x, params_bf16))
    ref_tanh = reference(x, *params, approximate=True)
    assert jnp.allclose(out_bf16, ref_tanh, atol=2e-2, rtol=2e-2), "bf16 path mismatch"

    # --- tiled shape: M=800 rows -> tm=512, grid of 2 (padded to 1024) ---
    B2, S2, E2 = 4, 200, 128
    x2 = jax.random.normal(kx2, (B2, S2, E2), jnp.float32)
    params2 = init_params(kp2, E2)
    params2_bf16 = prepare_params(params2)
    out2 = jax.block_until_ready(_run(x2, params2_bf16, block_m=512))
    ref2 = reference(x2, *params2, approximate=True)
    assert out2.shape == (B2, S2, E2)
    assert jnp.allclose(out2, ref2, atol=3e-2, rtol=3e-2), "tiled bf16 path mismatch"

    print("KERNEL_OK")
</pallas_src>

<mosaic_0001>
module attributes {stable_mosaic.version = 11 : i64} {
  func.func @gpt2_mlp_kernel(%arg0: i32, %arg1: memref<8x32xf32, #tpu.memory_space<vmem>>, %arg2: memref<32x64xf32, #tpu.memory_space<vmem>>, %arg3: memref<1x64xf32, #tpu.memory_space<vmem>>, %arg4: memref<64x64xf32, #tpu.memory_space<vmem>>, %arg5: memref<1x64xf32, #tpu.memory_space<vmem>>, %arg6: memref<64x32xf32, #tpu.memory_space<vmem>>, %arg7: memref<1x32xf32, #tpu.memory_space<vmem>>, %arg8: memref<8x32xf32, #tpu.memory_space<vmem>>) attributes {dimension_semantics = [#tpu.dimension_semantics<parallel>], iteration_bounds = array<i64: 2>, scalar_prefetch = 0 : i64, scratch_operands = 0 : i64, tpu.core_type = #tpu.core_type<tc>, window_params = [{transform_indices = @transform_0, window_bounds = array<i64: 8, 32>}, {pipeline_mode = #tpu.pipeline_mode<synchronous>, transform_indices = @transform_1, window_bounds = array<i64: 32, 64>}, {pipeline_mode = #tpu.pipeline_mode<synchronous>, transform_indices = @transform_2, window_bounds = array<i64: 1, 64>}, {pipeline_mode = #tpu.pipeline_mode<synchronous>, transform_indices = @transform_3, window_bounds = array<i64: 64, 64>}, {pipeline_mode = #tpu.pipeline_mode<synchronous>, transform_indices = @transform_4, window_bounds = array<i64: 1, 64>}, {pipeline_mode = #tpu.pipeline_mode<synchronous>, transform_indices = @transform_5, window_bounds = array<i64: 64, 32>}, {pipeline_mode = #tpu.pipeline_mode<synchronous>, transform_indices = @transform_6, window_bounds = array<i64: 1, 32>}, {transform_indices = @transform_7, window_bounds = array<i64: 8, 32>}]} {
    %c0 = arith.constant 0 : index
    %c0_0 = arith.constant 0 : index
    %0 = vector.load %arg1[%c0, %c0_0] : memref<8x32xf32, #tpu.memory_space<vmem>>, vector<8x32xf32>
    %c0_1 = arith.constant 0 : index
    %c0_2 = arith.constant 0 : index
    %1 = vector.load %arg2[%c0_1, %c0_2] : memref<32x64xf32, #tpu.memory_space<vmem>>, vector<32x64xf32>
    %cst = arith.constant dense<0.000000e+00> : vector<8x64xf32>
    %2 = tpu.matmul %0, %1, %cst {dimension_numbers = #tpu.dot_dimension_numbers<[1], [0], [0], [1], [0, 0, 1, 1], [], []>} : vector<8x32xf32>, vector<32x64xf32>, vector<8x64xf32> -> vector<8x64xf32>
    %c0_3 = arith.constant 0 : index
    %c0_4 = arith.constant 0 : index
    %3 = vector.load %arg3[%c0_3, %c0_4] : memref<1x64xf32, #tpu.memory_space<vmem>>, vector<1x64xf32>
    %4 = vector.broadcast %3 : vector<1x64xf32> to vector<8x64xf32>
    %5 = arith.addf %2, %4 : vector<8x64xf32>
    %cst_5 = arith.constant 5.000000e-01 : f32
    %6 = vector.broadcast %cst_5 : f32 to vector<8x64xf32>
    %7 = arith.mulf %6, %5 : vector<8x64xf32>
    %cst_6 = arith.constant 0.707106769 : f32
    %8 = vector.broadcast %cst_6 : f32 to vector<8x64xf32>
    %9 = arith.mulf %5, %8 : vector<8x64xf32>
    %10 = math.erf %9 : vector<8x64xf32>
    %cst_7 = arith.constant 1.000000e+00 : f32
    %11 = vector.broadcast %cst_7 : f32 to vector<8x64xf32>
    %12 = arith.addf %11, %10 : vector<8x64xf32>
    %13 = arith.mulf %7, %12 : vector<8x64xf32>
    %c0_8 = arith.constant 0 : index
    %c0_9 = arith.constant 0 : index
    %14 = vector.load %arg4[%c0_8, %c0_9] : memref<64x64xf32, #tpu.memory_space<vmem>>, vector<64x64xf32>
    %cst_10 = arith.constant dense<0.000000e+00> : vector<8x64xf32>
    %15 = tpu.matmul %13, %14, %cst_10 {dimension_numbers = #tpu.dot_dimension_numbers<[1], [0], [0], [1], [0, 0, 1, 1], [], []>} : vector<8x64xf32>, vector<64x64xf32>, vector<8x64xf32> -> vector<8x64xf32>
    %c0_11 = arith.constant 0 : index
    %c0_12 = arith.constant 0 : index
    %16 = vector.load %arg5[%c0_11, %c0_12] : memref<1x64xf32, #tpu.memory_space<vmem>>, vector<1x64xf32>
    %17 = vector.broadcast %16 : vector<1x64xf32> to vector<8x64xf32>
    %18 = arith.addf %15, %17 : vector<8x64xf32>
    %cst_13 = arith.constant 5.000000e-01 : f32
    %19 = vector.broadcast %cst_13 : f32 to vector<8x64xf32>
    %20 = arith.mulf %19, %18 : vector<8x64xf32>
    %cst_14 = arith.constant 0.707106769 : f32
    %21 = vector.broadcast %cst_14 : f32 to vector<8x64xf32>
    %22 = arith.mulf %18, %21 : vector<8x64xf32>
    %23 = math.erf %22 : vector<8x64xf32>
    %cst_15 = arith.constant 1.000000e+00 : f32
    %24 = vector.broadcast %cst_15 : f32 to vector<8x64xf32>
    %25 = arith.addf %24, %23 : vector<8x64xf32>
    %26 = arith.mulf %20, %25 : vector<8x64xf32>
    %c0_16 = arith.constant 0 : index
    %c0_17 = arith.constant 0 : index
    %27 = vector.load %arg6[%c0_16, %c0_17] : memref<64x32xf32, #tpu.memory_space<vmem>>, vector<64x32xf32>
    %cst_18 = arith.constant dense<0.000000e+00> : vector<8x32xf32>
    %28 = tpu.matmul %26, %27, %cst_18 {dimension_numbers = #tpu.dot_dimension_numbers<[1], [0], [0], [1], [0, 0, 1, 1], [], []>} : vector<8x64xf32>, vector<64x32xf32>, vector<8x32xf32> -> vector<8x32xf32>
    %c0_19 = arith.constant 0 : index
    %c0_20 = arith.constant 0 : index
    %29 = vector.load %arg7[%c0_19, %c0_20] : memref<1x32xf32, #tpu.memory_space<vmem>>, vector<1x32xf32>
    %30 = vector.broadcast %29 : vector<1x32xf32> to vector<8x32xf32>
    %31 = arith.addf %28, %30 : vector<8x32xf32>
    %c0_21 = arith.constant 0 : index
    %c0_22 = arith.constant 0 : index
    %32 = vector.load %arg8[%c0_21, %c0_22] : memref<8x32xf32, #tpu.memory_space<vmem>>, vector<8x32xf32>
    tpu.vector_store %arg8[%c0_21, %c0_22], %31 {strides = array<i32>} : memref<8x32xf32, #tpu.memory_space<vmem>>, vector<8x32xf32>,
    return
  }
  func.func @transform_0(%arg0: i32) -> (i32, i32) {
    %c0_i32 = arith.constant 0 : i32
    %c0_i32_0 = arith.constant 0 : i32
    return %arg0, %c0_i32 : i32, i32
  }
  func.func @transform_1(%arg0: i32) -> (i32, i32) {
    %c0_i32 = arith.constant 0 : i32
    %c0_i32_0 = arith.constant 0 : i32
    %c0_i32_1 = arith.constant 0 : i32
    return %c0_i32, %c0_i32_0 : i32, i32
  }
  func.func @transform_2(%arg0: i32) -> (i32, i32) {
    %c0_i32 = arith.constant 0 : i32
    %c0_i32_0 = arith.constant 0 : i32
    %c0_i32_1 = arith.constant 0 : i32
    return %c0_i32, %c0_i32_0 : i32, i32
  }
  func.func @transform_3(%arg0: i32) -> (i32, i32) {
    %c0_i32 = arith.constant 0 : i32
    %c0_i32_0 = arith.constant 0 : i32
    %c0_i32_1 = arith.constant 0 : i32
    return %c0_i32, %c0_i32_0 : i32, i32
  }
  func.func @transform_4(%arg0: i32) -> (i32, i32) {
    %c0_i32 = arith.constant 0 : i32
    %c0_i32_0 = arith.constant 0 : i32
    %c0_i32_1 = arith.constant 0 : i32
    return %c0_i32, %c0_i32_0 : i32, i32
  }
  func.func @transform_5(%arg0: i32) -> (i32, i32) {
    %c0_i32 = arith.constant 0 : i32
    %c0_i32_0 = arith.constant 0 : i32
    %c0_i32_1 = arith.constant 0 : i32
    return %c0_i32, %c0_i32_0 : i32, i32
  }
  func.func @transform_6(%arg0: i32) -> (i32, i32) {
    %c0_i32 = arith.constant 0 : i32
    %c0_i32_0 = arith.constant 0 : i32
    %c0_i32_1 = arith.constant 0 : i32
    return %c0_i32, %c0_i32_0 : i32, i32
  }
  func.func @transform_7(%arg0: i32) -> (i32, i32) {
    %c0_i32 = arith.constant 0 : i32
    %c0_i32_0 = arith.constant 0 : i32
    return %arg0, %c0_i32 : i32, i32
  }
}

</mosaic_0001>

<bundles_post_ra>
// kernel: gpt2_mlp.1
= control target key start
LH: loop header
LB: loop body
LE: loop exit
PB: predicated region body
PF: predicated region fallthrough
CT: control target
= control target key end

     0   :  { %12 = vsyncpa [#allocation3], 0  ;;  %s987_s0 = inlined_call_operand.hbm [shape: f32[16,32], index: 0, kind: input, shape index: {}]   ;;  %s988_s1 = inlined_call_operand.vmem [shape: f32[32,64], index: 1, kind: input, shape index: {}]   ;;  %s989_s2 = inlined_call_operand.vmem [shape: f32[1,64], index: 2, kind: input, shape index: {}]   ;;  %s990_s3 = inlined_call_operand.vmem [shape: f32[64,64], index: 3, kind: input, shape index: {}]   ;;  %s991_s4 = inlined_call_operand.vmem [shape: f32[1,64], index: 4, kind: input, shape index: {}]   ;;  %s992_s5 = inlined_call_operand.vmem [shape: f32[64,32], index: 5, kind: input, shape index: {}]   ;;  %s993_s6 = inlined_call_operand.vmem [shape: f32[1,32], index: 6, kind: input, shape index: {}]   ;;  %s994_s7 = inlined_call_operand.hbm [shape: f32[16,32], index: 7, kind: output, shape index: {}]  }
   0x1   :  { %14 = vsyncpa [#allocation3 + $0x1], 0 }
   0x2   :  { %15 = vsyncpa [#allocation4], 0 }
   0x3   :  { %17 = vsyncpa [#allocation4 + $0x1], 0  ;;  %s783_s24 = smov 0   ;;  %s785_s25 = smov 0  }
   0x4   :  { %s787_s26 = smov 0   ;;  %s789_s27 = smov 0  }
   0x5 LB: > { %s804_s28 = sadd.s32 4294967295, %s741_s27   ;;  %s575_s29 = sadd.s32 4294967294, %s741_s27   ;;  %s741_s27 = sphi %s789_s27, %s1006_s27   ;;  %s737_s26 = sphi %s787_s26, %s1005_s26   ;;  %s733_s25 = sphi %s785_s25, %s1004_s25   ;;  %s729_s24 = sphi %s783_s24, %s1003_s24  }
   0x6   : > { %s808_s30 = sadd.s32 1, %s741_s27   ;;  %s30_s8 = sadd.s32 1, %s737_s26 }
   0x7   : > { %s27_s9 = ssub.s32 %s741_s27, %s808_s30  ;;  %p37_p0 = scmp.ne.s32.totalorder %s737_s26, %s733_s25 }
   0x8   : > { %p28_p1 = scmp.eq.s32.totalorder %s27_s9, 0  ;;  %p38_p2 = scmp.eq.s32.totalorder %s741_s27, 0 }
   0x9   : > { %p43_p3 = scmp.ne.s32.totalorder %s733_s25, %s729_s24  ;;  %p44_p4 = scmp.eq.s32.totalorder %s804_s28, 0 }
   0xa   : > { %s820_s10 = scalar_select %p28_p1, %s737_s26, %s30_s8  }
   0xb   : > { %p822_p5 = por %p38_p2, %p37_p0  ;;  %p826_p6 = por %p44_p4, %p43_p3 }
   0xc   : > { %995 = sst [smem:[#allocation8_spill]] %s820_s10  ;;  %p193_p7 = scmp.eq.s32.totalorder %s804_s28, 1 }
   0xd   : > { %p199_p8 = scmp.eq.s32.totalorder %s575_s29, 1  ;;  %p604_p10 = scmp.lt.s32.totalorder %s741_s27, 2 }
   0xe   : > { %p833_p11 = por %p193_p7, %p37_p0  ;;  %s237_s15 = sand.u32 1, %s737_s26  }
   0xf   : > { %p837_p12 = por %p199_p8, %p43_p3  ;;  %s579_s16 = sshll.u32 %s741_s27, 3 }
  0x10   : > { %s578_s17 = sshll.u32 %s237_s15, 3  ;;  %s245_s20 = scalar_lea.hbm %s987_s0, %s579_s16 }
  0x11   : > { %s247_s21 = sshll.u32 %s245_s20, 4  ;;  %s241_s22 = scalar_lea.vmem [#allocation2], %s578_s17  ;;  %s248_s21 = int_to_ptr.hbm [resolvable:$true] %s247_s21 }
  0x12   : > { %s249_s23 = sshll.u32 %s241_s22, 4  ;;  %p848_p13 = pnand %p604_p10, %p822_p5  ;;  %s250_s23 = int_to_ptr.vmem [resolvable:$true] %s249_s23 }
  0x13   : > { %p580_p0 = scmp.ge.s32.totalorder %s741_s27, 1  ;;  %p254_p1 = scmp.lt.s32.totalorder %s741_s27, 3 }
  0x14   : > { %s238_s8 = scalar_lea.sflag [#allocation3], %s237_s15  ;;  %s645_s9 = sshra.s32 %s248_s21, 4  ;;  %s646_s9 = int_to_ptr.hbm [resolvable:$true] %s645_s9 }
  0x15   : > { %s647_s10 = scalar_lea.hbm %s646_s9, 8  ;;  %p649_p3 = pneg %p848_p13 }
  0x16   : > { %p648_p2 = scmp.ne.s32.totalorder %s646_s9, %s647_s10  ;;  %s652_s11 = scalar_lea.hbm %s987_s0, 16 }
  0x17   : > { %p653_p5 = scmp.lt.s32.totalorder %s646_s9, %s987_s0  ;;  %p654_p8 = scmp.lt.s32.totalorder %s652_s11, %s647_s10 }
  0x18   : > { %p650_p4 = pnand %p649_p3, %p648_p2 }
  0x19   : > { %p655_p10 = por %p654_p8, %p653_p5 }
  0x1a   : > { %p651_p7 = pneg %p650_p4 }
  0x1c   : > { %p656_p9 = pnand %p655_p10, %p651_p7 }
  0x1e   : > { %659 = shalt.err (!%p656_p9)
}
  0x1f   : > { %599 = dma.hbm_to_vmem [thread:$0]  (!%p848_p13), %s248_s21, 128, %s250_s23, %s238_s8  }
  0x20   : > { %p255_p2 = pnand %p580_p0, %p254_p1 }
  0x21   : > { %s869_s15 = sand.u32 (!%p255_p2), 1, %s733_s25  }
  0x22   : > { %258 = sbr.rel (%p255_p2) target bundleno = 543 (0x21f), region = 48  ;;  %s581_s10 = sshll.u32 (!%p255_p2), %s869_s15, 3 }
  0x23   : > { %s261_s20 = scalar_lea.sflag (!%p255_p2), [#allocation3], %s869_s15  ;;  %s264_s22 = scalar_lea.vmem (!%p255_p2), [#allocation2], %s581_s10 }
  0x27   : > { %720 = dma.done.wait (%p826_p6), %s261_s20, 128  }
  0x28   : > { %722 = vsyncadd (%p826_p6), %s261_s20, 4294967168  ;;  %v300_v0 = vld [vmem:[%s988_s1 + $0x18] sm:$0xff]  ;;  %v299_v1 = vld [vmem:[%s988_s1 + $0x10] sm:$0xff]  ;;  %vm305_vm0 = vcmask 261120   ;;  %vm385_vm5 = vcmask 523264   ;;  %s589_s16 = sshll.u32 %s804_s28, 3 }
  0x29   : > { %321 = vmatpush.msra.mxu0 %v300_v0  ;;  %v298_v2 = vld [vmem:[%s988_s1 + $0x8] sm:$0xff]  ;;  %v297_v3 = vld [vmem:[%s988_s1] sm:$0xff]  ;;  %v380_v11 = vld [vmem:[%s990_s3 + $0x38] sm:$0xff]  ;;  %s500_s12 = scalar_lea.hbm %s994_s7, %s589_s16  ;;  %s295_s20 = scalar_lea.vmem [#allocation5], %s581_s10 }
  0x2a   : > { %v296_v4 = vld [vmem:[%s264_s22] sm:$0xff]  ;;  %397 = vmatpush.msra.mxu1 %v380_v11  ;;  %v379_v14 = vld [vmem:[%s990_s3 + $0x30] sm:$0xff]  ;;  %v376_v21 = vld [vmem:[%s990_s3 + $0x18] sm:$0xff]  ;;  %s502_s22 = sshll.u32 %s295_s20, 4  ;;  %s504_s21 = sshll.u32 %s500_s12, 4  ;;  %s503_s22 = int_to_ptr.vmem [resolvable:$true] %s502_s22  ;;  %s505_s21 = int_to_ptr.hbm [resolvable:$true] %s504_s21 }
  0x2b   : > { %322 = vmatpush.msra.mxu0 %v299_v1  ;;  %v638_v5 = vld [vmem:[%s989_s2] ss:$0 sm:$0xff]  ;;  %v378_v17 = vld [vmem:[%s990_s3 + $0x28] sm:$0xff]  ;;  %v375_v23 = vld [vmem:[%s990_s3 + $0x10] sm:$0xff]  ;;  %s490_s28 = scalar_lea.sflag [#allocation4], %s869_s15  ;;  %s689_s23 = sshra.s32 %s505_s21, 4  ;;  %s690_s23 = int_to_ptr.hbm [resolvable:$true] %s689_s23 }
  0x2c   : > { %398 = vmatpush.msra.mxu1 %v379_v14  ;;  %v377_v20 = vld [vmem:[%s990_s3 + $0x20] sm:$0xff]  ;;  %v374_v26 = vld [vmem:[%s990_s3 + $0x8] sm:$0xff]  ;;  %v460_v61 = vld [vmem:[%s992_s5 + $0x38] sm:$0xff]  ;;  %s691_s29 = scalar_lea.hbm %s690_s23, 8  ;;  %s695_s10 = scalar_lea.hbm %s994_s7, 16 }
  0x2d   : > { %323 = vmatpush.msra.mxu0 %v298_v2  ;;  %v373_v28 = vld [vmem:[%s990_s3] sm:$0xff]  ;;  %476 = vmatpush.msra.mxu2 %v460_v61  ;;  %v459_v0 = vld [vmem:[%s992_s5 + $0x30] sm:$0xff]  ;;  %p692_p6 = scmp.ne.s32.totalorder %s690_s23, %s691_s29  ;;  %p696_p0 = scmp.lt.s32.totalorder %s690_s23, %s994_s7 }
  0x2e   : > { %399 = vmatpush.msra.mxu1 %v378_v17  ;;  %v639_v55 = vld [vmem:[%s991_s4] ss:$0 sm:$0xff]  ;;  %p697_p1 = scmp.lt.s32.totalorder %s695_s10, %s691_s29 }
  0x2f   : > { %324 = vmatpush.msra.mxu0 %v297_v3  ;;  %477 = vmatpush.msra.mxu2 %v459_v0  ;;  %v458_v3 = vld [vmem:[%s992_s5 + $0x28] sm:$0xff]  ;;  %v453_v14 = vld [vmem:[%s992_s5] sm:$0xff]  ;;  %p693_p9 = pnand %p692_p6, %p833_p11 }
  0x30   : > { %583 = vmatmul.msk.f32.vlgmr.msra.gmra.mxu0 %vm305_vm0, %v296_v4  ;;  %400 = vmatpush.msra.mxu1 %v377_v20  ;;  %p698_p3 = por %p697_p1, %p696_p0 }
  0x31   : > { %478 = vmatpush.msra.mxu2 %v458_v3  ;;  %p694_p13 = pneg %p693_p9 }
  0x32   : > { %401 = vmatpush.msra.mxu1 %v376_v21 }
  0x33   : > { %p699_p4 = pnand %p698_p3, %p694_p13 }
  0x34   : > { %402 = vmatpush.msra.mxu1 %v375_v23 }
  0x36   : > { %403 = vmatpush.msra.mxu1 %v374_v26 }
  0x38   : > { %404 = vmatpush.msra.mxu1 %v373_v28 }
  0xad   : > { %v326_v6 = vpop.f32.mrf.mxu0 }
  0xae   : > { %v327_v7 = vadd.f32 %v638_v5, %v326_v6  ;;  %v457_v6 = vld [vmem:[%s992_s5 + $0x20] sm:$0xff] }
  0xaf   : > { %479 = vmatpush.msra.mxu2 %v457_v6 }
  0xb0   : > { %v330_v8 = vmul.f32 0.70710677, %v327_v7  ;;  %v329_v52 = vmul.f32 0.5, %v327_v7  ;;  %v456_v7 = vld [vmem:[%s992_s5 + $0x18] sm:$0xff] }
  0xb1   : > { %480 = vmatpush.msra.mxu2 %v456_v7 }
  0xb2   : > { %v331_v9 = vmul.f32 %v330_v8, %v330_v8 }
  0xb4   : > { %v332_v10 = vmin.f32 %v331_v9, 16.0  ;;  %v455_v9 = vld [vmem:[%s992_s5 + $0x10] sm:$0xff] }
  0xb5   : > { %481 = vmatpush.msra.mxu2 %v455_v9 }
  0xb6   : > { %v333_v12 = vmul.f32 2.1237322e-06, %v332_v10  ;;  %v344_v13 = vmul.f32 3.8918573e-05, %v332_v10 }
  0xb8   : > { %v334_v15 = vadd.f32 0.00028619796, %v333_v12  ;;  %v345_v16 = vadd.f32 0.001143296, %v344_v13  ;;  %v454_v12 = vld [vmem:[%s992_s5 + $0x8] sm:$0xff] }
  0xb9   : > { %482 = vmatpush.msra.mxu2 %v454_v12 }
  0xba   : > { %v335_v18 = vmul.f32 %v334_v15, %v332_v10  ;;  %v346_v19 = vmul.f32 %v345_v16, %v332_v10 }
  0xbb   : > { %483 = vmatpush.msra.mxu2 %v453_v14 }
  0xbc   : > { %v347_v22 = vadd.f32 0.014752088, %v346_v19  ;;  %v336_v24 = vadd.f32 0.0036580483, %v335_v18 }
  0xbe   : > { %v348_v25 = vmul.f32 %v347_v22, %v332_v10  ;;  %v337_v29 = vmul.f32 %v336_v24, %v332_v10 }
  0xc0   : > { %v349_v27 = vadd.f32 0.112945676, %v348_v25  ;;  %v338_v32 = vadd.f32 0.05243302, %v337_v29 }
  0xc2   : > { %v350_v30 = vmul.f32 %v349_v27, %v332_v10  ;;  %v339_v35 = vmul.f32 %v338_v32, %v332_v10 }
  0xc4   : > { %v351_v31 = vadd.f32 0.4994258, %v350_v30  ;;  %v340_v36 = vadd.f32 0.18741608, %v339_v35 }
  0xc6   : > { %v352_v33 = vmul.f32 %v351_v31, %v332_v10  ;;  %v341_v38 = vmul.f32 %v340_v36, %v332_v10 }
  0xc8   : > { %v353_v34 = vadd.f32 1.0, %v352_v33  ;;  %v342_v42 = vadd.f32 1.1283791, %v341_v38 }
  0xca   : > { %641 = vrcp.f32 %v353_v34  ;;  %v365_v41 = vand.u32 2147483648, %v353_v34  ;;  %v363_v44 = vand.u32 2147483647, %v353_v34  ;;  %vm359_vm2 = vweird.f32 %v353_v34 }
  0xcb   : > { %v343_v47 = vmul.f32 %v342_v42, %v330_v8 }
  0xcc   : > { %v366_v46 = vor.u32 1.1754944e-38, %v365_v41  ;;  %vm364_vm4 = vcmp.eq.f32.partialorder %v363_v44, 8.507059e+37  ;;  %v640_v41 = vld [vmem:[%s993_s6] ss:$0 sm:$0xff] }
  0xd0   : > { %v642_v37 = vpop.eup %641 }
  0xd1   : > { %v355_v39 = vmul.f32 %v642_v37, %v353_v34  ;;  %vm360_vm1 = vweird.f32 %v642_v37 }
  0xd2   : > { %vm361_vm3 = vmor %vm359_vm2, %vm360_vm1 }
  0xd3   : > { %v356_v40 = vsub.f32 1.0, %v355_v39 }
  0xd5   : > { %v357_v43 = vmul.f32 %v642_v37, %v356_v40 }
  0xd7   : > { %v358_v45 = vadd.f32 %v642_v37, %v357_v43 }
  0xd9   : > { %v362_v48 = vsel %vm361_vm3, %v642_v37, %v358_v45 }
  0xda   : > { %v367_v49 = vsel %vm364_vm4, %v366_v46, %v362_v48 }
  0xdb   : > { %v368_v50 = vmul.f32 %v367_v49, %v343_v47 }
  0xdd   : > { %v584_v51 = vclamps-f32 %v368_v50, 1.0 }
  0xdf   : > { %v371_v53 = vadd.f32 1.0, %v584_v51 }
  0xe1   : > { %v372_v54 = vmul.f32 %v371_v53, %v329_v52 }
  0xe3   : > { %585 = vmatmul.msk.f32.vlgmr.msra.gmra.mxu1 %vm385_vm5, %v372_v54 }
 0x160   : > { %v406_v56 = vpop.f32.mrf.mxu1 }
 0x161   : > { %v407_v57 = vadd.f32 %v639_v55, %v406_v56 }
 0x163   : > { %v410_v58 = vmul.f32 0.70710677, %v407_v57  ;;  %v409_v38 = vmul.f32 0.5, %v407_v57 }
 0x165   : > { %v411_v59 = vmul.f32 %v410_v58, %v410_v58 }
 0x167   : > { %v412_v60 = vmin.f32 %v411_v59, 16.0 }
 0x169   : > { %v413_v62 = vmul.f32 2.1237322e-06, %v412_v60  ;;  %v424_v63 = vmul.f32 3.8918573e-05, %v412_v60 }
 0x16b   : > { %v414_v1 = vadd.f32 0.00028619796, %v413_v62  ;;  %v425_v2 = vadd.f32 0.001143296, %v424_v63 }
 0x16d   : > { %v415_v4 = vmul.f32 %v414_v1, %v412_v60  ;;  %v426_v5 = vmul.f32 %v425_v2, %v412_v60 }
 0x16f   : > { %v427_v8 = vadd.f32 0.014752088, %v426_v5  ;;  %v416_v10 = vadd.f32 0.0036580483, %v415_v4 }
 0x171   : > { %v428_v11 = vmul.f32 %v427_v8, %v412_v60  ;;  %v417_v15 = vmul.f32 %v416_v10, %v412_v60 }
 0x173   : > { %v429_v13 = vadd.f32 0.112945676, %v428_v11  ;;  %v418_v18 = vadd.f32 0.05243302, %v417_v15 }
 0x175   : > { %v430_v16 = vmul.f32 %v429_v13, %v412_v60  ;;  %v419_v21 = vmul.f32 %v418_v18, %v412_v60 }
 0x177   : > { %v431_v17 = vadd.f32 0.4994258, %v430_v16  ;;  %v420_v22 = vadd.f32 0.18741608, %v419_v21 }
 0x179   : > { %v432_v19 = vmul.f32 %v431_v17, %v412_v60  ;;  %v421_v24 = vmul.f32 %v420_v22, %v412_v60 }
 0x17b   : > { %v433_v20 = vadd.f32 1.0, %v432_v19  ;;  %v422_v28 = vadd.f32 1.1283791, %v421_v24 }
 0x17d   : > { %643 = vrcp.f32 %v433_v20  ;;  %v445_v27 = vand.u32 2147483648, %v433_v20  ;;  %v443_v30 = vand.u32 2147483647, %v433_v20  ;;  %vm439_vm7 = vweird.f32 %v433_v20 }
 0x17e   : > { %v423_v33 = vmul.f32 %v422_v28, %v410_v58 }
 0x17f   : > { %v446_v32 = vor.u32 1.1754944e-38, %v445_v27  ;;  %vm444_vm9 = vcmp.eq.f32.partialorder %v443_v30, 8.507059e+37 }
 0x183   : > { %v644_v23 = vpop.eup %643 }
 0x184   : > { %v435_v25 = vmul.f32 %v644_v23, %v433_v20  ;;  %vm440_vm6 = vweird.f32 %v644_v23 }
 0x185   : > { %vm441_vm8 = vmor %vm439_vm7, %vm440_vm6 }
 0x186   : > { %v436_v26 = vsub.f32 1.0, %v435_v25 }
 0x188   : > { %v437_v29 = vmul.f32 %v644_v23, %v436_v26 }
 0x18a   : > { %v438_v31 = vadd.f32 %v644_v23, %v437_v29 }
 0x18c   : > { %v442_v34 = vsel %vm441_vm8, %v644_v23, %v438_v31 }
 0x18d   : > { %v447_v35 = vsel %vm444_vm9, %v446_v32, %v442_v34 }
 0x18e   : > { %v448_v36 = vmul.f32 %v447_v35, %v423_v33 }
 0x190   : > { %v586_v37 = vclamps-f32 %v448_v36, 1.0 }
 0x192   : > { %v451_v39 = vadd.f32 1.0, %v586_v37 }
 0x194   : > { %v452_v40 = vmul.f32 %v451_v39, %v409_v38 }
 0x196   : > { %587 = vmatmul.msk.f32.vlgmr.msra.gmra.mxu2 %vm385_vm5, %v452_v40 }
 0x219   : > { %v485_v42 = vpop.f32.mrf.mxu2 }
 0x21a   : > { %v486_v43 = vadd.f32 %v640_v41, %v485_v42 }
 0x21c   : > { %488 = vst.msk [vmem:[%s295_s20] sm:$0xff] %vm305_vm0, %v486_v43 }
 0x21d   : > { %702 = shalt.err (!%p699_p4)
}
 0x21e   : > { %594 = dma.vmem_to_hbm [thread:$0]  (%p833_p11), %s503_s22, 128, %s505_s21, %s490_s28  }
 0x21f PF: > { %s516_s15 = sand.u32 1, %s729_s24   ;;  %p1001_p7 = scmp.ge.s32.totalorder %s741_s27, 2 }
 0x220   : > { %s517_s11 = scalar_lea.sflag [#allocation4], %s516_s15 }
 0x221   : > { %p601_p5 = pnand %p1001_p7, %p837_p12 }
 0x223   : > { %p602_p8 = pneg %p601_p5 }
 0x225   : > { %724 = dma.done.wait (%p602_p8), %s517_s11, 128  }
 0x226   : > { %726 = vsyncadd (%p602_p8), %s517_s11, 4294967168  ;;  %s1002_s12 = sld [smem:[#allocation8_spill]]  ;;  %p20_p10 = scmp.ge.s32.totalorder %s808_s30, 4  }
 0x227   : > { %s1003_s24 = smov %s733_s25  ;;  %s1004_s25 = smov %s737_s26 }
 0x228   : > { %s1006_s27 = smov %s808_s30  ;;  %22 = sbr.rel (!%p20_p10) target bundleno = 5 (0x5), region = 93 }
 0x22c   : > { %s1005_s26 = smov %s1002_s12 }
 0x22d   :  { %523 = vsyncpa [#allocation3], 1 }
 0x22e   :  { %525 = vsyncpa [#allocation3 + $0x1], 1 }
 0x22f   :  { %526 = vsyncpa [#allocation4], 1 }
 0x230   :  { %528 = vsyncpa [#allocation4 + $0x1], 1 }

</bundles_post_ra>
